<compile_context>
chip_gen: v7x
topology: tpu7x:2x2x1
jax: 0.10.0
libtpu: 0.0.40
codegen_flags: <defaults>
</compile_context>

<pallas_src>
import math

import jax
import jax.numpy as jnp
from jax.experimental import pallas as pl
from jax.experimental.pallas import tpu as pltpu


_GELU_C = math.sqrt(2.0 / math.pi)


def _gelu_new(x):
    # HF "gelu_new": 0.5*x*(1 + tanh(sqrt(2/pi)*(x + 0.044715*x^3)))
    return 0.5 * x * (1.0 + jnp.tanh(_GELU_C * (x + 0.044715 * x * x * x)))


def _mlp_kernel(x_ref, w1_ref, b1_ref, w2_ref, b2_ref, o_ref, acc_ref):
    j = pl.program_id(2)  # reduction axis over the intermediate dim

    @pl.when(j == 0)
    def _init():
        # Fold b_out into the accumulator init (one add per output block total).
        acc_ref[...] = jnp.broadcast_to(
            b2_ref[...].astype(jnp.float32), acc_ref.shape)

    x = x_ref[...]                                                    # (tm, E)
    # fc_in slab: (tm, E) @ (E, ti) + (1, ti); f32 accumulation on the MXU,
    # bias kept in f32.
    h = jnp.dot(x, w1_ref[...], preferred_element_type=jnp.float32) + b1_ref[...]
    # gelu_new in f32: tanh lands on the EUP slot (free under MXU saturation).
    h = _gelu_new(h)
    # fc_out partial product: (tm, ti) @ (ti, te), accumulate in f32 scratch.
    acc_ref[...] += jnp.dot(h.astype(w2_ref.dtype), w2_ref[...],
                            preferred_element_type=jnp.float32)

    @pl.when(j == pl.num_programs(2) - 1)
    def _finalize():
        # TODO(synk): resid_pdrop dropout is identity in eval mode; training
        # dropout would use pltpu.prng_seed + pltpu.prng_random_bits here.
        o_ref[...] = acc_ref[...].astype(o_ref.dtype)


def _round_up(x, m):
    return ((x + m - 1) // m) * m


def _chip_vmem_config():
    """Per-chip (tile working-set budget, vmem_limit_bytes)."""
    vmem_cap = None
    try:
        info = pltpu.get_tpu_info()
        vmem_cap = getattr(info, "vmem_capacity_bytes", None)
    except Exception:
        vmem_cap = None
    if vmem_cap is None:
        vmem_cap = 64 * 1024 * 1024            # unknown -> assume v7x-sized
    if vmem_cap >= 100 * 1024 * 1024:          # v5e / v6e: 128 MiB physical
        return 96 * 1024 * 1024, 110 * 1024 * 1024
    # v7x: 64 MiB per TensorCore -> keep headroom for compiler scratch/buffers.
    return 42 * 1024 * 1024, 52 * 1024 * 1024


def _est_vmem_bytes(tm, ti, te, E, dw, do):
    """Working-set estimate: double-buffered ins/outs + f32 accumulator."""
    return (2 * (tm * E * dw        # x block (compute dtype)
                 + E * ti * dw      # W_in column slab
                 + ti * 4           # b_in slab (f32)
                 + ti * te * dw     # W_out slab
                 + te * 4           # b_out slab (f32)
                 + tm * te * do)    # output block
            + tm * te * 4)          # f32 accumulator scratch


def _pick_tiles(M, E, I, compute_dtype, out_dtype, budget_bytes):
    """Pick (block_m, block_i): tm grows to the VMEM budget, ti stays >= 256."""
    dw = jnp.dtype(compute_dtype).itemsize
    do = jnp.dtype(out_dtype).itemsize
    align = 16 if min(dw, do) < 4 else 8
    tm_cap = min(_round_up(max(M, 1), align), 2048)

    # Intermediate-dim slab candidates: 512 preferred, then 256; whole-I for
    # small or non-128-divisible intermediate sizes (still correct, tm absorbs
    # any budget overshoot below).
    ti_cands = [c for c in (512, 256) if I % c == 0]
    if I <= 1024 and I not in ti_cands:
        ti_cands.insert(0, I)
    if not ti_cands and I % 128 == 0:
        ti_cands = [128]
    if not ti_cands:
        ti_cands = [I]

    te = E  # E-splitting (decode path) is decided by the caller afterwards.

    def max_tm(ti_):
        # est is affine in tm: est = A*tm + B.
        A = 2 * (E * dw + te * do) + te * 4
        B = _est_vmem_bytes(0, ti_, te, E, dw, do)
        tm_ = (budget_bytes - B) // A if budget_bytes > B else 0
        tm_ = (tm_ // align) * align
        return int(max(align, min(tm_, tm_cap)))

    best = None
    for ti_ in ti_cands:
        tm_ = max_tm(ti_)
        # Maximize tm first (arithmetic intensity), then prefer larger ti
        # (fewer grid steps / larger MXU N).
        if best is None or (tm_, ti_) > (best[0], best[1]):
            best = (tm_, ti_)
    return best  # (tm, ti)


def codegen_mlp(hidden_states, w_in, b_in, w_out, b_out, *,
                compute_dtype=jnp.bfloat16,
                block_m=None, block_i=None, block_e=None):
    """hidden_states: (B, S, E). w_in: (E, I), b_in: (I,), w_out: (I, E), b_out: (E,).

    compute_dtype: dtype fed to the MXU (default bf16; pass None to keep the
    caller's dtype). Accumulation / bias / gelu are always f32 inside.
    """
    B, S, E = hidden_states.shape
    I = w_in.shape[1]
    assert w_in.shape == (E, I) and w_out.shape == (I, E)
    M = B * S
    out_dtype = hidden_states.dtype

    cdt = jnp.dtype(out_dtype) if compute_dtype is None else jnp.dtype(compute_dtype)
    dw = cdt.itemsize
    do = jnp.dtype(out_dtype).itemsize
    align = 16 if min(dw, do) < 4 else 8

    budget, vmem_cap_limit = _chip_vmem_config()
    tm_auto, ti_auto = _pick_tiles(M, E, I, cdt, out_dtype, budget)
    tm = block_m if block_m is not None else tm_auto
    ti = block_i if block_i is not None else ti_auto
    assert tm % align == 0, f"block_m must be a multiple of {align}"
    assert I % ti == 0, "block_i must divide intermediate_size"
    assert ti == I or ti % 128 == 0, "block_i must be 128-aligned or the full I"

    # Cast activations / weights to the compute dtype; biases stay f32 so the
    # in-kernel bias adds happen in f32.
    x2d = hidden_states.reshape(M, E).astype(cdt)
    w1 = w_in.astype(cdt)
    w2 = w_out.astype(cdt)
    b1 = b_in.astype(jnp.float32).reshape(1, I)
    b2 = b_out.astype(jnp.float32).reshape(1, E)

    # Ragged M: pad rows to a multiple of block_m, slice back afterwards.
    M_pad = _round_up(M, tm)
    if M_pad != M:
        x2d = jnp.pad(x2d, ((0, M_pad - M), (0, 0)))

    # Decode / small-M path: with a single row block the "parallel" M axis has
    # one point, so split the output E dim into parallel slabs to keep the
    # second v7x TensorCore busy (weight traffic unchanged; only the tiny x
    # block and fc_in work are duplicated).
    if block_e is not None:
        te = block_e
    elif M_pad // tm < 2 and E % 256 == 0:
        te = E // 2
    else:
        te = E
    assert E % te == 0, "block_e must divide n_embd"
    assert te == E or te % 128 == 0, "block_e must be 128-aligned or the full E"

    grid = (M_pad // tm, E // te, I // ti)

    est_bytes = _est_vmem_bytes(tm, ti, te, E, dw, do)
    vmem_limit = int(min(max(est_bytes + 8 * 1024 * 1024, 32 * 1024 * 1024),
                         vmem_cap_limit))

    out2d = pl.pallas_call(
        _mlp_kernel,
        out_shape=jax.ShapeDtypeStruct((M_pad, E), out_dtype),
        grid_spec=pltpu.PrefetchScalarGridSpec(
            num_scalar_prefetch=0,
            grid=grid,
            in_specs=[
                pl.BlockSpec((tm, E), lambda i, e, j: (i, 0)),   # x rows (invariant in e, j)
                pl.BlockSpec((E, ti), lambda i, e, j: (0, j)),   # W_in column slab
                pl.BlockSpec((1, ti), lambda i, e, j: (0, j)),   # b_in slab (f32)
                pl.BlockSpec((ti, te), lambda i, e, j: (j, e)),  # W_out slab
                pl.BlockSpec((1, te), lambda i, e, j: (0, e)),   # b_out slab (f32)
            ],
            out_specs=pl.BlockSpec((tm, te), lambda i, e, j: (i, e)),
            scratch_shapes=[pltpu.VMEM((tm, te), jnp.float32)],
        ),
        compiler_params=pltpu.CompilerParams(
            dimension_semantics=("parallel", "parallel", "arbitrary"),
            vmem_limit_bytes=vmem_limit),
    )(x2d, w1, b1, w2, b2)

    if M_pad != M:
        out2d = out2d[:M]
    return out2d.reshape(B, S, E)


def _reference(hidden_states, w_in, b_in, w_out, b_out):
    x = hidden_states.astype(jnp.float32)
    h = x @ w_in.astype(jnp.float32) + b_in.astype(jnp.float32)
    h = _gelu_new(h)
    return h @ w_out.astype(jnp.float32) + b_out.astype(jnp.float32)


if __name__ == "__main__":
    key = jax.random.PRNGKey(0)

    def make_params(k, E, I, dtype):
        k_w1, k_b1, k_w2, k_b2 = jax.random.split(k, 4)
        w_in = (jax.random.normal(k_w1, (E, I), dtype=jnp.float32) * 0.02).astype(dtype)
        b_in = (jax.random.normal(k_b1, (I,), dtype=jnp.float32) * 0.02).astype(dtype)
        w_out = (jax.random.normal(k_w2, (I, E), dtype=jnp.float32) * 0.02).astype(dtype)
        b_out = (jax.random.normal(k_b2, (E,), dtype=jnp.float32) * 0.02).astype(dtype)
        return w_in, b_in, w_out, b_out

    # --- Test 1: toy config matching the module (n_embd=32, intermediate=128),
    #     exact f32 compute path (compute_dtype=None) ---
    B, S, E = 2, 8, 32
    I = 4 * E
    k_x, k_p, key = jax.random.split(key, 3)
    x = jax.random.normal(k_x, (B, S, E), dtype=jnp.float32)
    params = make_params(k_p, E, I, jnp.float32)
    out = jax.block_until_ready(codegen_mlp(x, *params, compute_dtype=None))
    ref = _reference(x, *params)
    assert out.shape == (B, S, E)
    assert jnp.allclose(out, ref, atol=1e-4, rtol=1e-4), "mismatch (test 1)"

    # --- Test 2: multi-block (M, I) grid + ragged M, f32 I/O with default bf16
    #     compute (exercises tiling, f32 accumulator, wrapper cast) ---
    B, S, E = 2, 9, 128
    I = 4 * E  # 512
    k_x, k_p, key = jax.random.split(key, 3)
    x = jax.random.normal(k_x, (B, S, E), dtype=jnp.float32)
    params = make_params(k_p, E, I, jnp.float32)
    out = jax.block_until_ready(
        codegen_mlp(x, *params, block_m=16, block_i=128))
    ref = _reference(x, *params)
    assert out.shape == (B, S, E)
    assert jnp.allclose(out, ref, atol=2e-2, rtol=2e-2), "mismatch (test 2)"

    # --- Test 3: bf16 operands end-to-end (MXU path), f32 accumulation inside ---
    xb = x.astype(jnp.bfloat16)
    pb = [p.astype(jnp.bfloat16) for p in params]
    out_bf16 = jax.block_until_ready(
        codegen_mlp(xb, *pb, block_m=16, block_i=128))
    ref_bf16 = _reference(xb, *pb)
    assert out_bf16.shape == (B, S, E)
    assert jnp.allclose(out_bf16.astype(jnp.float32), ref_bf16,
                        atol=2e-2, rtol=2e-2), "mismatch (test 3, bf16)"

    # --- Test 4: decode-sized M -> E-split parallel axis (3-D grid, te < E) ---
    B, S, E = 1, 8, 256
    I = 4 * E  # 1024
    k_x, k_p, key = jax.random.split(key, 3)
    x = jax.random.normal(k_x, (B, S, E), dtype=jnp.float32)
    params = make_params(k_p, E, I, jnp.float32)
    out = jax.block_until_ready(codegen_mlp(x, *params))
    ref = _reference(x, *params)
    assert out.shape == (B, S, E)
    assert jnp.allclose(out, ref, atol=2e-2, rtol=2e-2), "mismatch (test 4)"

    print("KERNEL_OK")
</pallas_src>

<mosaic_0001>
module attributes {stable_mosaic.version = 11 : i64} {
  func.func @_mlp_kernel(%arg0: i32, %arg1: i32, %arg2: i32, %arg3: memref<16x32xf32, #tpu.memory_space<vmem>>, %arg4: memref<32x128xf32, #tpu.memory_space<vmem>>, %arg5: memref<1x128xf32, #tpu.memory_space<vmem>>, %arg6: memref<128x32xf32, #tpu.memory_space<vmem>>, %arg7: memref<1x32xf32, #tpu.memory_space<vmem>>, %arg8: memref<16x32xf32, #tpu.memory_space<vmem>>, %arg9: memref<16x32xf32, #tpu.memory_space<vmem>>) attributes {dimension_semantics = [#tpu.dimension_semantics<parallel>, #tpu.dimension_semantics<parallel>, #tpu.dimension_semantics<arbitrary>], iteration_bounds = array<i64: 1, 1, 1>, scalar_prefetch = 0 : i64, scratch_operands = 1 : i64, tpu.core_type = #tpu.core_type<tc>, window_params = [{transform_indices = @transform_0, window_bounds = array<i64: 16, 32>}, {transform_indices = @transform_1, window_bounds = array<i64: 32, 128>}, {transform_indices = @transform_2, window_bounds = array<i64: 1, 128>}, {transform_indices = @transform_3, window_bounds = array<i64: 128, 32>}, {transform_indices = @transform_4, window_bounds = array<i64: 1, 32>}, {transform_indices = @transform_5, window_bounds = array<i64: 16, 32>}]} {
    %c0_i32 = arith.constant 0 : i32
    %0 = arith.cmpi eq, %arg2, %c0_i32 : i32
    %1 = arith.extui %0 : i1 to i32
    %c0_i32_0 = arith.constant 0 : i32
    %2 = arith.cmpi ne, %1, %c0_i32_0 : i32
    scf.if %2 {
      %c0_19 = arith.constant 0 : index
      %c0_20 = arith.constant 0 : index
      %30 = vector.load %arg7[%c0_19, %c0_20] : memref<1x32xf32, #tpu.memory_space<vmem>>, vector<1x32xf32>
      %31 = vector.shape_cast %30 : vector<1x32xf32> to vector<1x32xf32>
      %32 = vector.broadcast %31 : vector<1x32xf32> to vector<16x32xf32>
      %c0_21 = arith.constant 0 : index
      %c0_22 = arith.constant 0 : index
      %33 = vector.load %arg9[%c0_21, %c0_22] : memref<16x32xf32, #tpu.memory_space<vmem>>, vector<16x32xf32>
      tpu.vector_store %arg9[%c0_21, %c0_22], %32 {strides = array<i32>} : memref<16x32xf32, #tpu.memory_space<vmem>>, vector<16x32xf32>,
    } else {
    }
    %c0 = arith.constant 0 : index
    %c0_1 = arith.constant 0 : index
    %3 = vector.load %arg3[%c0, %c0_1] : memref<16x32xf32, #tpu.memory_space<vmem>>, vector<16x32xf32>
    %c0_2 = arith.constant 0 : index
    %c0_3 = arith.constant 0 : index
    %4 = vector.load %arg4[%c0_2, %c0_3] : memref<32x128xf32, #tpu.memory_space<vmem>>, vector<32x128xf32>
    %cst = arith.constant dense<0.000000e+00> : vector<16x128xf32>
    %5 = tpu.matmul %3, %4, %cst {dimension_numbers = #tpu.dot_dimension_numbers<[1], [0], [0], [1], [0, 0, 1, 1], [], []>} : vector<16x32xf32>, vector<32x128xf32>, vector<16x128xf32> -> vector<16x128xf32>
    %c0_4 = arith.constant 0 : index
    %c0_5 = arith.constant 0 : index
    %6 = vector.load %arg5[%c0_4, %c0_5] : memref<1x128xf32, #tpu.memory_space<vmem>>, vector<1x128xf32>
    %7 = vector.broadcast %6 : vector<1x128xf32> to vector<16x128xf32>
    %8 = arith.addf %5, %7 : vector<16x128xf32>
    %cst_6 = arith.constant 5.000000e-01 : f32
    %9 = vector.broadcast %cst_6 : f32 to vector<16x128xf32>
    %10 = arith.mulf %9, %8 : vector<16x128xf32>
    %cst_7 = arith.constant 4.471500e-02 : f32
    %11 = vector.broadcast %cst_7 : f32 to vector<16x128xf32>
    %12 = arith.mulf %11, %8 : vector<16x128xf32>
    %13 = arith.mulf %12, %8 : vector<16x128xf32>
    %14 = arith.mulf %13, %8 : vector<16x128xf32>
    %15 = arith.addf %8, %14 : vector<16x128xf32>
    %cst_8 = arith.constant 0.797884583 : f32
    %16 = vector.broadcast %cst_8 : f32 to vector<16x128xf32>
    %17 = arith.mulf %16, %15 : vector<16x128xf32>
    %18 = math.tanh %17 : vector<16x128xf32>
    %cst_9 = arith.constant 1.000000e+00 : f32
    %19 = vector.broadcast %cst_9 : f32 to vector<16x128xf32>
    %20 = arith.addf %19, %18 : vector<16x128xf32>
    %21 = arith.mulf %10, %20 : vector<16x128xf32>
    %c0_10 = arith.constant 0 : index
    %c0_11 = arith.constant 0 : index
    %22 = vector.load %arg9[%c0_10, %c0_11] : memref<16x32xf32, #tpu.memory_space<vmem>>, vector<16x32xf32>
    %c0_12 = arith.constant 0 : index
    %c0_13 = arith.constant 0 : index
    %23 = vector.load %arg6[%c0_12, %c0_13] : memref<128x32xf32, #tpu.memory_space<vmem>>, vector<128x32xf32>
    %cst_14 = arith.constant dense<0.000000e+00> : vector<16x32xf32>
    %24 = tpu.matmul %21, %23, %cst_14 {dimension_numbers = #tpu.dot_dimension_numbers<[1], [0], [0], [1], [0, 0, 1, 1], [], []>} : vector<16x128xf32>, vector<128x32xf32>, vector<16x32xf32> -> vector<16x32xf32>
    %25 = arith.addf %22, %24 : vector<16x32xf32>
    %c0_15 = arith.constant 0 : index
    %c0_16 = arith.constant 0 : index
    %26 = vector.load %arg9[%c0_15, %c0_16] : memref<16x32xf32, #tpu.memory_space<vmem>>, vector<16x32xf32>
    tpu.vector_store %arg9[%c0_15, %c0_16], %25 {strides = array<i32>} : memref<16x32xf32, #tpu.memory_space<vmem>>, vector<16x32xf32>,
    %c0_i32_17 = arith.constant 0 : i32
    %27 = arith.cmpi eq, %arg2, %c0_i32_17 : i32
    %28 = arith.extui %27 : i1 to i32
    %c0_i32_18 = arith.constant 0 : i32
    %29 = arith.cmpi ne, %28, %c0_i32_18 : i32
    scf.if %29 {
      %c0_19 = arith.constant 0 : index
      %c0_20 = arith.constant 0 : index
      %30 = vector.load %arg9[%c0_19, %c0_20] : memref<16x32xf32, #tpu.memory_space<vmem>>, vector<16x32xf32>
      %c0_21 = arith.constant 0 : index
      %c0_22 = arith.constant 0 : index
      %31 = vector.load %arg8[%c0_21, %c0_22] : memref<16x32xf32, #tpu.memory_space<vmem>>, vector<16x32xf32>
      tpu.vector_store %arg8[%c0_21, %c0_22], %30 {strides = array<i32>} : memref<16x32xf32, #tpu.memory_space<vmem>>, vector<16x32xf32>,
    } else {
    }
    return
  }
  func.func @transform_0(%arg0: i32, %arg1: i32, %arg2: i32) -> (i32, i32) {
    %c0_i32 = arith.constant 0 : i32
    %c0_i32_0 = arith.constant 0 : i32
    return %arg0, %c0_i32 : i32, i32
  }
  func.func @transform_1(%arg0: i32, %arg1: i32, %arg2: i32) -> (i32, i32) {
    %c0_i32 = arith.constant 0 : i32
    %c0_i32_0 = arith.constant 0 : i32
    return %c0_i32, %arg2 : i32, i32
  }
  func.func @transform_2(%arg0: i32, %arg1: i32, %arg2: i32) -> (i32, i32) {
    %c0_i32 = arith.constant 0 : i32
    %c0_i32_0 = arith.constant 0 : i32
    return %c0_i32, %arg2 : i32, i32
  }
  func.func @transform_3(%arg0: i32, %arg1: i32, %arg2: i32) -> (i32, i32) {
    %c0_i32 = arith.constant 0 : i32
    return %arg2, %arg1 : i32, i32
  }
  func.func @transform_4(%arg0: i32, %arg1: i32, %arg2: i32) -> (i32, i32) {
    %c0_i32 = arith.constant 0 : i32
    %c0_i32_0 = arith.constant 0 : i32
    return %c0_i32, %arg1 : i32, i32
  }
  func.func @transform_5(%arg0: i32, %arg1: i32, %arg2: i32) -> (i32, i32) {
    %c0_i32 = arith.constant 0 : i32
    return %arg0, %arg1 : i32, i32
  }
}

</mosaic_0001>

<bundles_post_ra>
// kernel: tpu_custom_call.1
= control target key start
LH: loop header
LB: loop body
LE: loop exit
PB: predicated region body
PF: predicated region fallthrough
CT: control target
= control target key end

     0   :  { %vm32_vm0 = vcmask 261120   ;;  %s538_s0 = inlined_call_operand.vmem [shape: f32[16,32], index: 0, kind: input, shape index: {}]   ;;  %s539_s1 = inlined_call_operand.vmem [shape: f32[32,128], index: 1, kind: input, shape index: {}]   ;;  %s540_s2 = inlined_call_operand.vmem [shape: f32[1,128], index: 2, kind: input, shape index: {}]   ;;  %s541_s3 = inlined_call_operand.vmem [shape: f32[128,32], index: 3, kind: input, shape index: {}]   ;;  %s542_s4 = inlined_call_operand.vmem [shape: f32[1,32], index: 4, kind: input, shape index: {}]   ;;  %s543_s5 = inlined_call_operand.hbm [shape: f32[16,32], index: 5, kind: output, shape index: {}]  }
   0x1   :  { %v37_v0 = vld [vmem:[%s539_s1] sm:$0xff]  ;;  %v38_v1 = vld [vmem:[%s539_s1 + $0x8] sm:$0xff]  ;;  %v39_v2 = vld [vmem:[%s539_s1 + $0x10] sm:$0xff] }
   0x2   :  { %v342_v3 = vpack.c.bf16 %v38_v1, %v37_v0  ;;  %v40_v4 = vld [vmem:[%s539_s1 + $0x18] sm:$0xff]  ;;  %v35_v5 = vld [vmem:[%s538_s0] sm:$0xff]  ;;  %v151_v8 = vld [vmem:[%s541_s3 + $0x8] sm:$0xff] }
   0x3   :  { %v346_v6 = vpack.c.bf16 %v40_v4, %v39_v2  ;;  %304 = vmatprep.mubr.msk.f32.mxu0 %vm32_vm0, %v35_v5  ;;  %v150_v7 = vld [vmem:[%s541_s3] sm:$0xff] }
   0x4   :  { %10 = vsyncpa [#allocation4], 0  ;;  %343 = vmatprep.subr.bf16.mxu0 %v342_v3  ;;  %v350_v9 = vpack.c.bf16 %v151_v8, %v150_v7  ;;  %v36_v10 = vld [vmem:[%s538_s0 + $0x8] sm:$0xff]  ;;  %v152_v11 = vld [vmem:[%s541_s3 + $0x10] sm:$0xff] }
   0x5   :  { %345 = vmatpush3.bf16.msra.mxu0 %v342_v3  ;;  %v153_v12 = vld [vmem:[%s541_s3 + $0x18] sm:$0xff]  ;;  %v154_v14 = vld [vmem:[%s541_s3 + $0x20] sm:$0xff]  ;;  %v155_v15 = vld [vmem:[%s541_s3 + $0x28] sm:$0xff] }
   0x6   :  { %347 = vmatprep.subr.bf16.mxu0 %v346_v6  ;;  %351 = vmatprep.subr.bf16.mxu1 %v350_v9  ;;  %v354_v13 = vpack.c.bf16 %v153_v12, %v152_v11  ;;  %v358_v16 = vpack.c.bf16 %v155_v15, %v154_v14  ;;  %v156_v17 = vld [vmem:[%s541_s3 + $0x30] sm:$0xff]  ;;  %v157_v18 = vld [vmem:[%s541_s3 + $0x38] sm:$0xff]  ;;  %v158_v19 = vld [vmem:[%s541_s3 + $0x40] sm:$0xff] }
   0x7   :  { %353 = vmatpush3.bf16.msra.mxu1 %v350_v9  ;;  %v362_v20 = vpack.c.bf16 %v157_v18, %v156_v17  ;;  %v159_v21 = vld [vmem:[%s541_s3 + $0x48] sm:$0xff]  ;;  %v160_v23 = vld [vmem:[%s541_s3 + $0x50] sm:$0xff]  ;;  %v161_v24 = vld [vmem:[%s541_s3 + $0x58] sm:$0xff] }
   0x8   :  { %355 = vmatprep.subr.bf16.mxu1 %v354_v13  ;;  %v366_v22 = vpack.c.bf16 %v159_v21, %v158_v19  ;;  %v370_v25 = vpack.c.bf16 %v161_v24, %v160_v23  ;;  %v162_v26 = vld [vmem:[%s541_s3 + $0x60] sm:$0xff]  ;;  %v163_v27 = vld [vmem:[%s541_s3 + $0x68] sm:$0xff]  ;;  %v164_v29 = vld [vmem:[%s541_s3 + $0x70] sm:$0xff] }
   0x9   :  { %349 = vmatpush3.bf16.msra.mxu0 %v346_v6  ;;  %v374_v28 = vpack.c.bf16 %v163_v27, %v162_v26  ;;  %v165_v30 = vld [vmem:[%s541_s3 + $0x78] sm:$0xff]  ;;  %v268_v32 = vld [vmem:[%s542_s4] ss:$0 sm:$0xff] }
   0xa   :  { %v378_v31 = vpack.c.bf16 %v165_v30, %v164_v29  ;;  %34 = vst.msk [vmem:[#allocation2 + $0x8] sm:$0xff] %vm32_vm0, %v268_v32  ;;  %33 = vst.msk [vmem:[#allocation2] sm:$0xff] %vm32_vm0, %v268_v32  ;;  %v269_v33 = vld [vmem:[%s540_s2] ss:$0 sm:$0xff]  ;;  %s413_s2 = smov [#allocation3]  }
   0xb   :  { %357 = vmatpush3.bf16.msra.mxu1 %v354_v13  ;;  %s257_s3 = sshll.u32 %s413_s2, 4  ;;  %s258_s3 = int_to_ptr.vmem [resolvable:$true] %s257_s3 }
   0xc   :  { %305 = vmatmul.mubr.msk.f32.vlgmr.msra.gmra.mrb[0].mxu0 %vm32_vm0, %v36_v10  ;;  %359 = vmatprep.subr.bf16.mxu1 %v358_v16  ;;  %s389_s4 = scalar_lea.vmem %s258_s3, 256  ;;  %p394_p1 = scmp.lt.s32.totalorder %s258_s3, %s258_s3 }
   0xd   :  { %p390_p0 = scmp.ne.s32.totalorder %s258_s3, %s389_s4  ;;  %p395_p2 = scmp.lt.s32.totalorder %s389_s4, %s389_s4 }
   0xf   :  { %361 = vmatpush3.bf16.msra.mxu1 %v358_v16  ;;  %p396_p3 = por %p395_p2, %p394_p1 }
  0x10   :  { %363 = vmatprep.subr.bf16.mxu1 %v362_v20 }
  0x11   :  { %v149_v56 = vld [vmem:[#allocation2 + $0x8] sm:$0xff]  ;;  %v148_v57 = vld [vmem:[#allocation2] sm:$0xff]  ;;  %p397_p4 = pnand %p396_p3, %p390_p0 }
  0x13   :  { %365 = vmatpush3.bf16.msra.mxu1 %v362_v20 }
  0x14   :  { %367 = vmatprep.subr.bf16.mxu1 %v366_v22 }
  0x17   :  { %369 = vmatpush3.bf16.msra.mxu1 %v366_v22 }
  0x18   :  { %371 = vmatprep.subr.bf16.mxu1 %v370_v25 }
  0x1b   :  { %373 = vmatpush3.bf16.msra.mxu1 %v370_v25 }
  0x1c   :  { %375 = vmatprep.subr.bf16.mxu1 %v374_v28 }
  0x1f   :  { %377 = vmatpush3.bf16.msra.mxu1 %v374_v28 }
  0x20   :  { %379 = vmatprep.subr.bf16.mxu1 %v378_v31 }
  0x23   :  { %381 = vmatpush3.bf16.msra.mxu1 %v378_v31 }
  0xdf   :  { %v306_v34 = vpop.f32.mrb[0].mxu0 }
  0xe0   :  { %v127_v35 = vadd.f32 %v306_v34, %v269_v33  ;;  %v121_v36 = vpop.f32.mrb[1].mxu0 }
  0xe1   :  { %v122_v37 = vadd.f32 %v269_v33, %v121_v36 }
  0xe2   :  { %v133_v38 = vmul.f32 0.044715, %v127_v35  ;;  %v131_v53 = vmul.f32 0.5, %v127_v35 }
  0xe3   :  { %v132_v39 = vmul.f32 0.044715, %v122_v37  ;;  %v130_v51 = vmul.f32 0.5, %v122_v37 }
  0xe4   :  { %v135_v40 = vmul.f32 %v133_v38, %v127_v35 }
  0xe5   :  { %v134_v41 = vmul.f32 %v132_v39, %v122_v37 }
  0xe6   :  { %v137_v42 = vmul.f32 %v135_v40, %v127_v35 }
  0xe7   :  { %v136_v43 = vmul.f32 %v134_v41, %v122_v37 }
  0xe8   :  { %v139_v44 = vadd.f32 %v137_v42, %v127_v35 }
  0xe9   :  { %v138_v45 = vadd.f32 %v136_v43, %v122_v37 }
  0xea   :  { %v141_v46 = vmul.f32 0.7978846, %v139_v44 }
  0xeb   :  { %v140_v47 = vmul.f32 0.7978846, %v138_v45 }
  0xec   :  { %385 = vtanh.f32 %v141_v46 }
  0xed   :  { %387 = vtanh.f32 %v140_v47 }
  0xf6   :  { %v386_v48 = vpop.eup %385 }
  0xf7   :  { %v388_v49 = vpop.eup %387  ;;  %v145_v50 = vadd.f32 1.0, %v386_v48 }
  0xf8   :  { %v144_v52 = vadd.f32 1.0, %v388_v49 }
  0xf9   :  { %v147_v55 = vmul.f32 %v145_v50, %v131_v53 }
  0xfa   :  { %v146_v54 = vmul.f32 %v144_v52, %v130_v51 }
  0xfc   :  { %339 = vmatprep.mubr.f32.mxu1 %v146_v54 }
  0xfd   :  { %340 = vmatmul.mubr.f32.vlgmr.msra.gmra.mrb[0].mxu1 %v147_v55 }
 0x1d0   :  { %v341_v58 = vpop.f32.mrb[0].mxu1 }
 0x1d1   :  { %v242_v59 = vadd.f32 %v341_v58, %v149_v56  ;;  %v232_v60 = vpop.f32.mrb[1].mxu1 }
 0x1d2   :  { %v241_v61 = vadd.f32 %v232_v60, %v148_v57 }
 0x1d3   :  { %244 = vst.msk [vmem:[#allocation2 + $0x8] sm:$0xff] %vm32_vm0, %v242_v59 }
 0x1d4   :  { %243 = vst.msk [vmem:[#allocation2] sm:$0xff] %vm32_vm0, %v241_v61 }
 0x1da   :  { %v249_v62 = vld [vmem:[#allocation2 + $0x8] sm:$0xff] }
 0x1db   :  { %v248_v63 = vld [vmem:[#allocation2] sm:$0xff]  ;;  %251 = vst.msk [vmem:[#allocation3 + $0x8] sm:$0xff] %vm32_vm0, %v249_v62 }
 0x1dc   :  { %250 = vst.msk [vmem:[#allocation3] sm:$0xff] %vm32_vm0, %v248_v63 }
 0x1dd   :  { %400 = shalt.err (!%p397_p4)
}
 0x1de   :  { %s401_s15 = scalar_lea.hbm %s543_s5, 256 }
 0x1df   :  { %p402_p5 = scmp.ne.s32.totalorder %s543_s5, %s401_s15  ;;  %p405_p6 = scmp.lt.u32.totalorder %s401_s15, %s543_s5 }
 0x1e1   :  { %p407_p7 = pnand %p405_p6, %p402_p5 }
 0x1e3   :  { %410 = shalt.err (!%p407_p7)
}
 0x1e4   :  { %s414_s19 = smov 128   ;;  %s415_s20 = smov 8  }
 0x1e5   :  { %263 = dma.vmem_to_hbm [thread:$0]  %s258_s3, 256, %s543_s5, [#allocation4], %s414_s19, %s414_s19, %s415_s20  }
 0x1e6   :  { %411 = dma.done.wait [#allocation4], 256  }
 0x1e7   :  { %412 = vsyncadd [#allocation4], 4294967040 }
 0x1e8   :  { %267 = vsyncpa [#allocation4], 1 }

</bundles_post_ra>
